<compile_context>
chip_gen: v7x
topology: tpu7x:2x2x1
jax: 0.10.0
libtpu: 0.0.40
codegen_flags: <defaults>
</compile_context>

<pallas_src>
import functools

import jax
import jax.numpy as jnp
from jax.experimental import pallas as pl
from jax.experimental.pallas import tpu as pltpu


def _round_up(v, m):
    return ((v + m - 1) // m) * m


def _cont_head_kernel(x_ref, w_in_ref, b_in_ref, w_res_ref, b_res_ref,
                      w_out_ref, b_out_ref, out_ref, *, num_layers):
    # x tile: (TILE_M, D_in)
    x = x_ref[...].astype(jnp.float32)

    # Input layer: Linear(D_in -> H) + ReLU  (MXU matmul, f32 accumulation)
    h = jnp.dot(x, w_in_ref[...], preferred_element_type=jnp.float32) + b_in_ref[...]
    h = jnp.maximum(h, 0.0)

    # Residual blocks: h = relu(h @ W_l + b_l) + h   (static unroll; layer
    # count is a config constant)
    for l in range(num_layers):
        residual = h
        y = jnp.dot(h, w_res_ref[l], preferred_element_type=jnp.float32) + b_res_ref[l]
        h = jnp.maximum(y, 0.0) + residual

    # Final head: Linear(H -> 3)
    out = jnp.dot(h, w_out_ref[...], preferred_element_type=jnp.float32) + b_out_ref[...]
    out_ref[...] = out.astype(out_ref.dtype)


def cont_head_forward(x, params, *, num_layers, tile_m=512):
    """x: (M, input_dim) float32. Returns (M, 1, 3) — matches torch unsqueeze(1)."""
    w_in, b_in, w_res, b_res, w_out, b_out = params
    M, d_in = x.shape
    H = w_in.shape[1]
    L = num_layers

    # Large lane/row-dense tiles, but never bigger than the (8-padded) input.
    tile_m = min(tile_m, _round_up(M, 8))
    m_pad = _round_up(M, tile_m)
    if m_pad != M:
        x = jnp.pad(x, ((0, m_pad - M), (0, 0)))
    grid = (m_pad // tile_m,)

    flops = 2 * m_pad * (d_in * H + L * H * H + H * 3)
    bytes_accessed = 4 * (m_pad * d_in + m_pad * 3
                          + d_in * H + H + L * (H * H + H) + H * 3 + 3)

    out2d = pl.pallas_call(
        functools.partial(_cont_head_kernel, num_layers=L),
        out_shape=jax.ShapeDtypeStruct((m_pad, 3), x.dtype),
        grid=grid,
        in_specs=[
            pl.BlockSpec((tile_m, d_in), lambda i: (i, 0)),   # x: streamed row tiles
            pl.BlockSpec((d_in, H), lambda i: (0, 0)),        # W_in: resident
            pl.BlockSpec((1, H), lambda i: (0, 0)),           # b_in: resident
            pl.BlockSpec((L, H, H), lambda i: (0, 0, 0)),     # stacked residual Ws
            pl.BlockSpec((L, 1, H), lambda i: (0, 0, 0)),     # stacked residual bs
            pl.BlockSpec((H, 3), lambda i: (0, 0)),           # W_out: resident
            pl.BlockSpec((1, 3), lambda i: (0, 0)),           # b_out: resident
        ],
        out_specs=pl.BlockSpec((tile_m, 3), lambda i: (i, 0)),
        compiler_params=pltpu.CompilerParams(
            dimension_semantics=("parallel",),                # row tiles independent
            vmem_limit_bytes=32 * 1024 * 1024,
        ),
        cost_estimate=pl.CostEstimate(
            flops=flops, transcendentals=0, bytes_accessed=bytes_accessed),
    )(x, w_in, b_in, w_res, b_res, w_out, b_out)

    out2d = out2d[:M]
    return out2d[:, None, :]   # unsqueeze(1) -> (M, 1, 3)


if __name__ == "__main__":
    key = jax.random.PRNGKey(0)
    ks = jax.random.split(key, 7)

    # Small shapes consistent with the module: head_dim lane-dense at 128.
    batch, input_dim, head_dim, num_layers = 16, 64, 128, 2

    x = jax.random.normal(ks[0], (batch, input_dim), dtype=jnp.float32)
    w_in = jax.random.normal(ks[1], (input_dim, head_dim), jnp.float32) / jnp.sqrt(input_dim)
    b_in = jax.random.normal(ks[2], (1, head_dim), jnp.float32) * 0.01
    w_res = jax.random.normal(ks[3], (num_layers, head_dim, head_dim), jnp.float32) / jnp.sqrt(head_dim)
    b_res = jax.random.normal(ks[4], (num_layers, 1, head_dim), jnp.float32) * 0.01
    w_out = jax.random.normal(ks[5], (head_dim, 3), jnp.float32) / jnp.sqrt(head_dim)
    b_out = jax.random.normal(ks[6], (1, 3), jnp.float32) * 0.01

    params = (w_in, b_in, w_res, b_res, w_out, b_out)
    out = cont_head_forward(x, params, num_layers=num_layers)
    out = jax.block_until_ready(out)

    # Pure-JAX reference of the ContHead forward.
    h = jnp.maximum(x @ w_in + b_in, 0.0)
    for l in range(num_layers):
        r = h
        h = jnp.maximum(h @ w_res[l] + b_res[l], 0.0) + r
    ref = (h @ w_out + b_out)[:, None, :]

    assert out.shape == (batch, 1, 3)
    assert jnp.allclose(out, ref, atol=1e-3, rtol=1e-3), float(jnp.max(jnp.abs(out - ref)))

    print("KERNEL_OK")
</pallas_src>

<mosaic_0001>
module attributes {stable_mosaic.version = 11 : i64} {
  func.func @_cont_head_kernel(%arg0: i32, %arg1: memref<16x64xf32, #tpu.memory_space<vmem>>, %arg2: memref<64x128xf32, #tpu.memory_space<vmem>>, %arg3: memref<1x128xf32, #tpu.memory_space<vmem>>, %arg4: memref<2x128x128xf32, #tpu.memory_space<vmem>>, %arg5: memref<2x1x128xf32, #tpu.memory_space<vmem>>, %arg6: memref<128x3xf32, #tpu.memory_space<vmem>>, %arg7: memref<1x3xf32, #tpu.memory_space<vmem>>, %arg8: memref<16x3xf32, #tpu.memory_space<vmem>>) attributes {dimension_semantics = [#tpu.dimension_semantics<parallel>], iteration_bounds = array<i64: 1>, scalar_prefetch = 0 : i64, scratch_operands = 0 : i64, tpu.core_type = #tpu.core_type<tc>, window_params = [{transform_indices = @transform_0, window_bounds = array<i64: 16, 64>}, {pipeline_mode = #tpu.pipeline_mode<synchronous>, transform_indices = @transform_1, window_bounds = array<i64: 64, 128>}, {pipeline_mode = #tpu.pipeline_mode<synchronous>, transform_indices = @transform_2, window_bounds = array<i64: 1, 128>}, {pipeline_mode = #tpu.pipeline_mode<synchronous>, transform_indices = @transform_3, window_bounds = array<i64: 2, 128, 128>}, {pipeline_mode = #tpu.pipeline_mode<synchronous>, transform_indices = @transform_4, window_bounds = array<i64: 2, 1, 128>}, {pipeline_mode = #tpu.pipeline_mode<synchronous>, transform_indices = @transform_5, window_bounds = array<i64: 128, 3>}, {pipeline_mode = #tpu.pipeline_mode<synchronous>, transform_indices = @transform_6, window_bounds = array<i64: 1, 3>}, {transform_indices = @transform_7, window_bounds = array<i64: 16, 3>}]} {
    %c0 = arith.constant 0 : index
    %c0_0 = arith.constant 0 : index
    %0 = vector.load %arg1[%c0, %c0_0] : memref<16x64xf32, #tpu.memory_space<vmem>>, vector<16x64xf32>
    %c0_1 = arith.constant 0 : index
    %c0_2 = arith.constant 0 : index
    %1 = vector.load %arg2[%c0_1, %c0_2] : memref<64x128xf32, #tpu.memory_space<vmem>>, vector<64x128xf32>
    %cst = arith.constant dense<0.000000e+00> : vector<16x128xf32>
    %2 = tpu.matmul %0, %1, %cst {dimension_numbers = #tpu.dot_dimension_numbers<[1], [0], [0], [1], [0, 0, 1, 1], [], []>} : vector<16x64xf32>, vector<64x128xf32>, vector<16x128xf32> -> vector<16x128xf32>
    %c0_3 = arith.constant 0 : index
    %c0_4 = arith.constant 0 : index
    %3 = vector.load %arg3[%c0_3, %c0_4] : memref<1x128xf32, #tpu.memory_space<vmem>>, vector<1x128xf32>
    %4 = vector.broadcast %3 : vector<1x128xf32> to vector<16x128xf32>
    %5 = arith.addf %2, %4 : vector<16x128xf32>
    %cst_5 = arith.constant 0.000000e+00 : f32
    %6 = vector.broadcast %cst_5 : f32 to vector<16x128xf32>
    %7 = arith.maximumf %5, %6 : vector<16x128xf32>
    %c0_6 = arith.constant 0 : index
    %c0_7 = arith.constant 0 : index
    %c0_8 = arith.constant 0 : index
    %8 = vector.load %arg4[%c0_6, %c0_7, %c0_8] : memref<2x128x128xf32, #tpu.memory_space<vmem>>, vector<1x128x128xf32>
    %9 = vector.shape_cast %8 : vector<1x128x128xf32> to vector<128x128xf32>
    %cst_9 = arith.constant dense<0.000000e+00> : vector<16x128xf32>
    %10 = tpu.matmul %7, %9, %cst_9 {dimension_numbers = #tpu.dot_dimension_numbers<[1], [0], [0], [1], [0, 0, 1, 1], [], []>} : vector<16x128xf32>, vector<128x128xf32>, vector<16x128xf32> -> vector<16x128xf32>
    %c0_10 = arith.constant 0 : index
    %c0_11 = arith.constant 0 : index
    %c0_12 = arith.constant 0 : index
    %11 = vector.load %arg5[%c0_10, %c0_11, %c0_12] : memref<2x1x128xf32, #tpu.memory_space<vmem>>, vector<1x1x128xf32>
    %12 = vector.shape_cast %11 : vector<1x1x128xf32> to vector<1x128xf32>
    %13 = vector.broadcast %12 : vector<1x128xf32> to vector<16x128xf32>
    %14 = arith.addf %10, %13 : vector<16x128xf32>
    %cst_13 = arith.constant 0.000000e+00 : f32
    %15 = vector.broadcast %cst_13 : f32 to vector<16x128xf32>
    %16 = arith.maximumf %14, %15 : vector<16x128xf32>
    %17 = arith.addf %16, %7 : vector<16x128xf32>
    %c1 = arith.constant 1 : index
    %c0_14 = arith.constant 0 : index
    %c0_15 = arith.constant 0 : index
    %18 = vector.load %arg4[%c1, %c0_14, %c0_15] : memref<2x128x128xf32, #tpu.memory_space<vmem>>, vector<1x128x128xf32>
    %19 = vector.shape_cast %18 : vector<1x128x128xf32> to vector<128x128xf32>
    %cst_16 = arith.constant dense<0.000000e+00> : vector<16x128xf32>
    %20 = tpu.matmul %17, %19, %cst_16 {dimension_numbers = #tpu.dot_dimension_numbers<[1], [0], [0], [1], [0, 0, 1, 1], [], []>} : vector<16x128xf32>, vector<128x128xf32>, vector<16x128xf32> -> vector<16x128xf32>
    %c1_17 = arith.constant 1 : index
    %c0_18 = arith.constant 0 : index
    %c0_19 = arith.constant 0 : index
    %21 = vector.load %arg5[%c1_17, %c0_18, %c0_19] : memref<2x1x128xf32, #tpu.memory_space<vmem>>, vector<1x1x128xf32>
    %22 = vector.shape_cast %21 : vector<1x1x128xf32> to vector<1x128xf32>
    %23 = vector.broadcast %22 : vector<1x128xf32> to vector<16x128xf32>
    %24 = arith.addf %20, %23 : vector<16x128xf32>
    %cst_20 = arith.constant 0.000000e+00 : f32
    %25 = vector.broadcast %cst_20 : f32 to vector<16x128xf32>
    %26 = arith.maximumf %24, %25 : vector<16x128xf32>
    %27 = arith.addf %26, %17 : vector<16x128xf32>
    %c0_21 = arith.constant 0 : index
    %c0_22 = arith.constant 0 : index
    %28 = vector.load %arg6[%c0_21, %c0_22] : memref<128x3xf32, #tpu.memory_space<vmem>>, vector<128x3xf32>
    %cst_23 = arith.constant dense<0.000000e+00> : vector<16x3xf32>
    %29 = tpu.matmul %27, %28, %cst_23 {dimension_numbers = #tpu.dot_dimension_numbers<[1], [0], [0], [1], [0, 0, 1, 1], [], []>} : vector<16x128xf32>, vector<128x3xf32>, vector<16x3xf32> -> vector<16x3xf32>
    %c0_24 = arith.constant 0 : index
    %c0_25 = arith.constant 0 : index
    %30 = vector.load %arg7[%c0_24, %c0_25] : memref<1x3xf32, #tpu.memory_space<vmem>>, vector<1x3xf32>
    %31 = vector.broadcast %30 : vector<1x3xf32> to vector<16x3xf32>
    %32 = arith.addf %29, %31 : vector<16x3xf32>
    %c0_26 = arith.constant 0 : index
    %c0_27 = arith.constant 0 : index
    %33 = vector.load %arg8[%c0_26, %c0_27] : memref<16x3xf32, #tpu.memory_space<vmem>>, vector<16x3xf32>
    tpu.vector_store %arg8[%c0_26, %c0_27], %32 {strides = array<i32>} : memref<16x3xf32, #tpu.memory_space<vmem>>, vector<16x3xf32>,
    return
  }
  func.func @transform_0(%arg0: i32) -> (i32, i32) {
    %c0_i32 = arith.constant 0 : i32
    %c0_i32_0 = arith.constant 0 : i32
    return %arg0, %c0_i32 : i32, i32
  }
  func.func @transform_1(%arg0: i32) -> (i32, i32) {
    %c0_i32 = arith.constant 0 : i32
    %c0_i32_0 = arith.constant 0 : i32
    %c0_i32_1 = arith.constant 0 : i32
    return %c0_i32, %c0_i32_0 : i32, i32
  }
  func.func @transform_2(%arg0: i32) -> (i32, i32) {
    %c0_i32 = arith.constant 0 : i32
    %c0_i32_0 = arith.constant 0 : i32
    %c0_i32_1 = arith.constant 0 : i32
    return %c0_i32, %c0_i32_0 : i32, i32
  }
  func.func @transform_3(%arg0: i32) -> (i32, i32, i32) {
    %c0_i32 = arith.constant 0 : i32
    %c0_i32_0 = arith.constant 0 : i32
    %c0_i32_1 = arith.constant 0 : i32
    %c0_i32_2 = arith.constant 0 : i32
    return %c0_i32, %c0_i32_0, %c0_i32_1 : i32, i32, i32
  }
  func.func @transform_4(%arg0: i32) -> (i32, i32, i32) {
    %c0_i32 = arith.constant 0 : i32
    %c0_i32_0 = arith.constant 0 : i32
    %c0_i32_1 = arith.constant 0 : i32
    %c0_i32_2 = arith.constant 0 : i32
    return %c0_i32, %c0_i32_0, %c0_i32_1 : i32, i32, i32
  }
  func.func @transform_5(%arg0: i32) -> (i32, i32) {
    %c0_i32 = arith.constant 0 : i32
    %c0_i32_0 = arith.constant 0 : i32
    %c0_i32_1 = arith.constant 0 : i32
    return %c0_i32, %c0_i32_0 : i32, i32
  }
  func.func @transform_6(%arg0: i32) -> (i32, i32) {
    %c0_i32 = arith.constant 0 : i32
    %c0_i32_0 = arith.constant 0 : i32
    %c0_i32_1 = arith.constant 0 : i32
    return %c0_i32, %c0_i32_0 : i32, i32
  }
  func.func @transform_7(%arg0: i32) -> (i32, i32) {
    %c0_i32 = arith.constant 0 : i32
    %c0_i32_0 = arith.constant 0 : i32
    return %arg0, %c0_i32 : i32, i32
  }
}

</mosaic_0001>

<bundles_post_ra>
// kernel: tpu_custom_call.1
= control target key start
LH: loop header
LB: loop body
LE: loop exit
PB: predicated region body
PF: predicated region fallthrough
CT: control target
= control target key end

     0   :  { %12 = vsyncpa [#allocation3], 0  ;;  %s787_s24 = smov [#allocation2]   ;;  %s940_s0 = inlined_call_operand.vmem [shape: f32[16,64], index: 0, kind: input, shape index: {}]   ;;  %s941_s1 = inlined_call_operand.vmem [shape: f32[64,128], index: 1, kind: input, shape index: {}]   ;;  %s942_s2 = inlined_call_operand.vmem [shape: f32[1,128], index: 2, kind: input, shape index: {}]   ;;  %s943_s3 = inlined_call_operand.hbm [shape: f32[2,128,128], index: 3, kind: input, shape index: {}]   ;;  %s944_s4 = inlined_call_operand.vmem [shape: f32[2,1,128], index: 4, kind: input, shape index: {}]   ;;  %s945_s5 = inlined_call_operand.vmem [shape: f32[128,3], index: 5, kind: input, shape index: {}]   ;;  %s946_s6 = inlined_call_operand.vmem [shape: f32[1,3], index: 6, kind: input, shape index: {}]   ;;  %s947_s7 = inlined_call_operand.vmem [shape: f32[16,3], index: 7, kind: output, shape index: {}]  }
   0x1   :  { %s24_s25 = sshll.u32 %s787_s24, 4  ;;  %s763_s28 = scalar_lea.hbm %s943_s3, 4096  ;;  %s25_s25 = int_to_ptr.vmem [resolvable:$true] %s24_s25 }
   0x2   :  { %p764_p0 = scmp.ne.s32.totalorder %s943_s3, %s763_s28  ;;  %p767_p1 = scmp.lt.u32.totalorder %s763_s28, %s943_s3 }
   0x4   :  { %p769_p2 = pnand %p767_p1, %p764_p0 }
   0x6   :  { %772 = shalt.err (!%p769_p2)
}
   0x7   :  { %s773_s10 = scalar_lea.vmem %s25_s25, 4096  ;;  %p778_p4 = scmp.lt.s32.totalorder %s25_s25, %s25_s25 }
   0x8   :  { %p774_p3 = scmp.ne.s32.totalorder %s25_s25, %s773_s10  ;;  %p779_p5 = scmp.lt.s32.totalorder %s773_s10, %s773_s10 }
   0xa   :  { %p780_p6 = por %p779_p5, %p778_p4 }
   0xc   :  { %p781_p7 = pnand %p780_p6, %p774_p3 }
   0xe   :  { %784 = shalt.err (!%p781_p7)
}
   0xf   :  { %s788_s11 = smov 128   ;;  %s789_s12 = smov 8  }
  0x10   :  { %30 = dma.hbm_to_vmem [thread:$0]  %s943_s3, 4096, %s25_s25, [#allocation3], %s788_s11, %s788_s11, %s789_s12  }
  0x11   :  { %785 = dma.done.wait [#allocation3], 4096  }
  0x12   :  { %786 = vsyncadd [#allocation3], 4294963200  ;;  %v42_v0 = vld [vmem:[%s941_s1] sm:$0xff]  ;;  %v43_v1 = vld [vmem:[%s941_s1 + $0x8] sm:$0xff]  ;;  %vm57_vm0 = vcmask 523264   ;;  %vm445_vm1 = vcmask 23552  }
  0x13   :  { %v44_v2 = vld [vmem:[%s941_s1 + $0x10] sm:$0xff]  ;;  %v648_v3 = vpack.c.bf16 %v43_v1, %v42_v0  ;;  %v45_v4 = vld [vmem:[%s941_s1 + $0x18] sm:$0xff]  ;;  %v46_v6 = vld [vmem:[%s941_s1 + $0x20] sm:$0xff] }
  0x14   :  { %v652_v5 = vpack.c.bf16 %v45_v4, %v44_v2  ;;  %v47_v7 = vld [vmem:[%s941_s1 + $0x28] sm:$0xff]  ;;  %v40_v8 = vld [vmem:[%s940_s0] sm:$0xff]  ;;  %v143_v12 = vld [vmem:[#allocation2 + $0x10] sm:$0xff] }
  0x15   :  { %649 = vmatprep.subr.bf16.mxu0 %v648_v3  ;;  %540 = vmatprep.mubr.msk.f32.mxu0 %vm57_vm0, %v40_v8  ;;  %v141_v9 = vld [vmem:[#allocation2] sm:$0xff]  ;;  %v142_v10 = vld [vmem:[#allocation2 + $0x8] sm:$0xff]  ;;  %v144_v13 = vld [vmem:[#allocation2 + $0x18] sm:$0xff]  ;;  %v656_v14 = vpack.c.bf16 %v47_v7, %v46_v6 }
  0x16   :  { %651 = vmatpush3.bf16.msra.mxu0 %v648_v3  ;;  %v664_v11 = vpack.c.bf16 %v142_v10, %v141_v9  ;;  %v668_v15 = vpack.c.bf16 %v144_v13, %v143_v12  ;;  %v145_v16 = vld [vmem:[#allocation2 + $0x20] sm:$0xff]  ;;  %v146_v17 = vld [vmem:[#allocation2 + $0x28] sm:$0xff]  ;;  %v48_v18 = vld [vmem:[%s941_s1 + $0x30] sm:$0xff] }
  0x17   :  { %653 = vmatprep.subr.bf16.mxu0 %v652_v5  ;;  %v49_v19 = vld [vmem:[%s941_s1 + $0x38] sm:$0xff]  ;;  %v672_v20 = vpack.c.bf16 %v146_v17, %v145_v16  ;;  %v147_v22 = vld [vmem:[#allocation2 + $0x30] sm:$0xff]  ;;  %v149_v25 = vld [vmem:[#allocation2 + $0x40] sm:$0xff] }
  0x18   :  { %665 = vmatprep.subr.bf16.mxu1 %v664_v11  ;;  %v660_v21 = vpack.c.bf16 %v49_v19, %v48_v18  ;;  %v148_v23 = vld [vmem:[#allocation2 + $0x38] sm:$0xff]  ;;  %v150_v26 = vld [vmem:[#allocation2 + $0x48] sm:$0xff]  ;;  %v151_v29 = vld [vmem:[#allocation2 + $0x50] sm:$0xff] }
  0x19   :  { %667 = vmatpush3.bf16.msra.mxu1 %v664_v11  ;;  %v676_v24 = vpack.c.bf16 %v148_v23, %v147_v22  ;;  %v41_v27 = vld [vmem:[%s940_s0 + $0x8] sm:$0xff]  ;;  %v680_v28 = vpack.c.bf16 %v150_v26, %v149_v25  ;;  %v152_v30 = vld [vmem:[#allocation2 + $0x58] sm:$0xff]  ;;  %v153_v32 = vld [vmem:[#allocation2 + $0x60] sm:$0xff] }
  0x1a   :  { %655 = vmatpush3.bf16.msra.mxu0 %v652_v5  ;;  %669 = vmatprep.subr.bf16.mxu1 %v668_v15  ;;  %v684_v31 = vpack.c.bf16 %v152_v30, %v151_v29  ;;  %v154_v33 = vld [vmem:[#allocation2 + $0x68] sm:$0xff]  ;;  %v155_v35 = vld [vmem:[#allocation2 + $0x70] sm:$0xff]  ;;  %v156_v36 = vld [vmem:[#allocation2 + $0x78] sm:$0xff] }
  0x1b   :  { %657 = vmatprep.subr.bf16.mxu0 %v656_v14  ;;  %v688_v34 = vpack.c.bf16 %v154_v33, %v153_v32  ;;  %v692_v37 = vpack.c.bf16 %v156_v36, %v155_v35  ;;  %v244_v38 = vld [vmem:[#allocation2 + $0x80] sm:$0xff]  ;;  %v245_v39 = vld [vmem:[#allocation2 + $0x88] sm:$0xff]  ;;  %v246_v40 = vld [vmem:[#allocation2 + $0x90] sm:$0xff] }
  0x1c   :  { %v696_v41 = vpack.c.bf16 %v245_v39, %v244_v38  ;;  %v247_v42 = vld [vmem:[#allocation2 + $0x98] sm:$0xff]  ;;  %v248_v44 = vld [vmem:[#allocation2 + $0xa0] sm:$0xff]  ;;  %v249_v45 = vld [vmem:[#allocation2 + $0xa8] sm:$0xff] }
  0x1d   :  { %671 = vmatpush3.bf16.msra.mxu1 %v668_v15  ;;  %v700_v43 = vpack.c.bf16 %v247_v42, %v246_v40  ;;  %v704_v46 = vpack.c.bf16 %v249_v45, %v248_v44  ;;  %v250_v47 = vld [vmem:[#allocation2 + $0xb0] sm:$0xff]  ;;  %v251_v48 = vld [vmem:[#allocation2 + $0xb8] sm:$0xff]  ;;  %v252_v50 = vld [vmem:[#allocation2 + $0xc0] sm:$0xff] }
  0x1e   :  { %659 = vmatpush3.bf16.msra.mxu0 %v656_v14  ;;  %673 = vmatprep.subr.bf16.mxu1 %v672_v20  ;;  %v708_v49 = vpack.c.bf16 %v251_v48, %v250_v47  ;;  %v253_v51 = vld [vmem:[#allocation2 + $0xc8] sm:$0xff]  ;;  %v254_v53 = vld [vmem:[#allocation2 + $0xd0] sm:$0xff]  ;;  %v255_v54 = vld [vmem:[#allocation2 + $0xd8] sm:$0xff] }
  0x1f   :  { %661 = vmatprep.subr.bf16.mxu0 %v660_v21  ;;  %v712_v52 = vpack.c.bf16 %v253_v51, %v252_v50  ;;  %v716_v55 = vpack.c.bf16 %v255_v54, %v254_v53  ;;  %v453_v56 = vld [vmem:[%s942_s2] ss:$0 sm:$0xff]  ;;  %v257_v0 = vld [vmem:[#allocation2 + $0xe8] sm:$0xff]  ;;  %v258_v2 = vld [vmem:[#allocation2 + $0xf0] sm:$0xff] }
  0x20   :  { %v256_v63 = vld [vmem:[#allocation2 + $0xe0] sm:$0xff]  ;;  %v259_v3 = vld [vmem:[#allocation2 + $0xf8] sm:$0xff]  ;;  %v348_v6 = vld [vmem:[%s945_s5 + $0x8] sm:$0xff] }
  0x21   :  { %675 = vmatpush3.bf16.msra.mxu1 %v672_v20  ;;  %v720_v1 = vpack.c.bf16 %v257_v0, %v256_v63  ;;  %v724_v4 = vpack.c.bf16 %v259_v3, %v258_v2  ;;  %v347_v5 = vld [vmem:[%s945_s5] sm:$0xff]  ;;  %v349_v7 = vld [vmem:[%s945_s5 + $0x10] sm:$0xff]  ;;  %v350_v9 = vld [vmem:[%s945_s5 + $0x18] sm:$0xff] }
  0x22   :  { %663 = vmatpush3.bf16.msra.mxu0 %v660_v21  ;;  %677 = vmatprep.subr.bf16.mxu1 %v676_v24  ;;  %v728_v8 = vpack.c.bf16 %v348_v6, %v347_v5  ;;  %v732_v10 = vpack.c.bf16 %v350_v9, %v349_v7  ;;  %v351_v11 = vld [vmem:[%s945_s5 + $0x20] sm:$0xff]  ;;  %v352_v12 = vld [vmem:[%s945_s5 + $0x28] sm:$0xff]  ;;  %v353_v14 = vld [vmem:[%s945_s5 + $0x30] sm:$0xff] }
  0x23   :  { %697 = vmatprep.subr.bf16.mxu0 %v696_v41  ;;  %v736_v13 = vpack.c.bf16 %v352_v12, %v351_v11  ;;  %v354_v15 = vld [vmem:[%s945_s5 + $0x38] sm:$0xff]  ;;  %v355_v17 = vld [vmem:[%s945_s5 + $0x40] sm:$0xff]  ;;  %v356_v18 = vld [vmem:[%s945_s5 + $0x48] sm:$0xff] }
  0x24   :  { %v740_v16 = vpack.c.bf16 %v354_v15, %v353_v14  ;;  %v744_v19 = vpack.c.bf16 %v356_v18, %v355_v17  ;;  %v357_v20 = vld [vmem:[%s945_s5 + $0x50] sm:$0xff]  ;;  %v358_v21 = vld [vmem:[%s945_s5 + $0x58] sm:$0xff]  ;;  %v456_v23 = vld [vmem:[%s944_s4] ss:$0 sm:$0xff] }
  0x25   :  { %541 = vmatmul.mubr.msk.f32.vlgmr.msra.gmra.mrb[0].mxu0 %vm57_vm0, %v41_v27  ;;  %679 = vmatpush3.bf16.msra.mxu1 %v676_v24  ;;  %v748_v22 = vpack.c.bf16 %v358_v21, %v357_v20  ;;  %v359_v32 = vld [vmem:[%s945_s5 + $0x60] sm:$0xff]  ;;  %v360_v33 = vld [vmem:[%s945_s5 + $0x68] sm:$0xff]  ;;  %v361_v35 = vld [vmem:[%s945_s5 + $0x70] sm:$0xff] }
  0x26   :  { %681 = vmatprep.subr.bf16.mxu1 %v680_v28  ;;  %699 = vmatpush3.bf16.msra.mxu0 %v696_v41  ;;  %v362_v36 = vld [vmem:[%s945_s5 + $0x78] sm:$0xff]  ;;  %v458_v38 = vld [vmem:[%s944_s4 + $0x1] ss:$0 sm:$0xff]  ;;  %v459_v47 = vld [vmem:[%s946_s6] ss:$0 sm:$0xff] }
  0x27   :  { %701 = vmatprep.subr.bf16.mxu0 %v700_v43 }
  0x29   :  { %683 = vmatpush3.bf16.msra.mxu1 %v680_v28 }
  0x2a   :  { %685 = vmatprep.subr.bf16.mxu1 %v684_v31  ;;  %703 = vmatpush3.bf16.msra.mxu0 %v700_v43 }
  0x2b   :  { %705 = vmatprep.subr.bf16.mxu0 %v704_v46 }
  0x2d   :  { %687 = vmatpush3.bf16.msra.mxu1 %v684_v31 }
  0x2e   :  { %689 = vmatprep.subr.bf16.mxu1 %v688_v34  ;;  %707 = vmatpush3.bf16.msra.mxu0 %v704_v46 }
  0x2f   :  { %709 = vmatprep.subr.bf16.mxu0 %v708_v49 }
  0x31   :  { %691 = vmatpush3.bf16.msra.mxu1 %v688_v34  ;;  %v752_v34 = vpack.c.bf16 %v360_v33, %v359_v32 }
  0x32   :  { %693 = vmatprep.subr.bf16.mxu1 %v692_v37  ;;  %711 = vmatpush3.bf16.msra.mxu0 %v708_v49 }
  0x33   :  { %713 = vmatprep.subr.bf16.mxu0 %v712_v52 }
  0x35   :  { %695 = vmatpush3.bf16.msra.mxu1 %v692_v37  ;;  %v756_v37 = vpack.c.bf16 %v362_v36, %v361_v35 }
  0x36   :  { %715 = vmatpush3.bf16.msra.mxu0 %v712_v52  ;;  %729 = vmatprep.subr.bf16.mxu1 %v728_v8 }
  0x37   :  { %717 = vmatprep.subr.bf16.mxu0 %v716_v55 }
  0x3a   :  { %719 = vmatpush3.bf16.msra.mxu0 %v716_v55 }
  0x3b   :  { %721 = vmatprep.subr.bf16.mxu0 %v720_v1 }
  0x3e   :  { %723 = vmatpush3.bf16.msra.mxu0 %v720_v1 }
  0x3f   :  { %725 = vmatprep.subr.bf16.mxu0 %v724_v4 }
  0x42   :  { %727 = vmatpush3.bf16.msra.mxu0 %v724_v4 }
  0xf8   :  { %v542_v57 = vpop.f32.mrb[0].mxu0 }
  0xf9   :  { %v136_v58 = vadd.f32 %v542_v57, %v453_v56  ;;  %v130_v59 = vpop.f32.mrb[1].mxu0 }
  0xfa   :  { %v131_v60 = vadd.f32 %v453_v56, %v130_v59 }
  0xfb   :  { %v140_v62 = vmax.f32 %v136_v58, 0.0 }
  0xfc   :  { %v139_v61 = vmax.f32 %v131_v60, 0.0 }
  0xfe   :  { %575 = vmatprep.mubr.f32.mxu1 %v139_v61 }
  0xff   :  { %576 = vmatmul.mubr.f32.vlgmr.msra.gmra.mrb[0].mxu1 %v140_v62 }
 0x100   :  { %731 = vmatpush3.bf16.msra.mxu1 %v728_v8 }
 0x101   :  { %733 = vmatprep.subr.bf16.mxu1 %v732_v10 }
 0x104   :  { %735 = vmatpush3.bf16.msra.mxu1 %v732_v10 }
 0x105   :  { %737 = vmatprep.subr.bf16.mxu1 %v736_v13 }
 0x108   :  { %739 = vmatpush3.bf16.msra.mxu1 %v736_v13 }
 0x109   :  { %741 = vmatprep.subr.bf16.mxu1 %v740_v16 }
 0x10c   :  { %743 = vmatpush3.bf16.msra.mxu1 %v740_v16 }
 0x10d   :  { %745 = vmatprep.subr.bf16.mxu1 %v744_v19 }
 0x110   :  { %747 = vmatpush3.bf16.msra.mxu1 %v744_v19 }
 0x111   :  { %749 = vmatprep.subr.bf16.mxu1 %v748_v22 }
 0x114   :  { %751 = vmatpush3.bf16.msra.mxu1 %v748_v22 }
 0x115   :  { %753 = vmatprep.subr.bf16.mxu1 %v752_v34 }
 0x118   :  { %755 = vmatpush3.bf16.msra.mxu1 %v752_v34 }
 0x119   :  { %757 = vmatprep.subr.bf16.mxu1 %v756_v37 }
 0x11c   :  { %759 = vmatpush3.bf16.msra.mxu1 %v756_v37 }
 0x1d2   :  { %v577_v24 = vpop.f32.mrb[0].mxu1 }
 0x1d3   :  { %v236_v25 = vadd.f32 %v577_v24, %v456_v23  ;;  %v230_v26 = vpop.f32.mrb[1].mxu1 }
 0x1d4   :  { %v231_v27 = vadd.f32 %v456_v23, %v230_v26 }
 0x1d5   :  { %v240_v28 = vmax.f32 %v236_v25, 0.0 }
 0x1d6   :  { %v239_v29 = vmax.f32 %v231_v27, 0.0 }
 0x1d7   :  { %v242_v31 = vadd.f32 %v240_v28, %v140_v62 }
 0x1d8   :  { %v241_v30 = vadd.f32 %v239_v29, %v139_v61 }
 0x1da   :  { %610 = vmatprep.mubr.f32.mxu0 %v241_v30 }
 0x1db   :  { %611 = vmatmul.mubr.f32.vlgmr.msra.gmra.mrb[2].mxu0 %v242_v31 }
 0x2ae   :  { %v612_v39 = vpop.f32.mrb[2].mxu0 }
 0x2af   :  { %v340_v40 = vadd.f32 %v612_v39, %v458_v38  ;;  %v334_v41 = vpop.f32.mrb[3].mxu0 }
 0x2b0   :  { %v335_v42 = vadd.f32 %v458_v38, %v334_v41 }
 0x2b1   :  { %v344_v43 = vmax.f32 %v340_v40, 0.0 }
 0x2b2   :  { %v343_v44 = vmax.f32 %v335_v42, 0.0 }
 0x2b3   :  { %v346_v46 = vadd.f32 %v344_v43, %v242_v31 }
 0x2b4   :  { %v345_v45 = vadd.f32 %v343_v44, %v241_v30 }
 0x2b6   :  { %645 = vmatprep.mubr.f32.mxu1 %v345_v45 }
 0x2b7   :  { %646 = vmatmul.mubr.f32.vlgmr.msra.gmra.mrb[2].mxu1 %v346_v46 }
 0x38a   :  { %v647_v48 = vpop.f32.mrb[2].mxu1 }
 0x38b   :  { %v442_v49 = vadd.f32 %v647_v48, %v459_v47  ;;  %v436_v50 = vpop.f32.mrb[3].mxu1 }
 0x38c   :  { %v437_v51 = vadd.f32 %v459_v47, %v436_v50 }
 0x38d   :  { %447 = vst.msk [vmem:[%s947_s7 + $0x8] sm:$0xff] %vm445_vm1, %v442_v49 }
 0x38e   :  { %446 = vst.msk [vmem:[%s947_s7] sm:$0xff] %vm445_vm1, %v437_v51 }
 0x38f   :  { %452 = vsyncpa [#allocation3], 1 }

</bundles_post_ra>
